<compile_context>
chip_gen: v7x
topology: tpu7x:2x2x1
jax: 0.10.0
libtpu: 0.0.40
codegen_flags: <defaults>
</compile_context>

<pallas_src>
import math

import jax
import jax.numpy as jnp
from jax.experimental import pallas as pl
from jax.experimental.pallas import tpu as pltpu

_LANE = 128
_SUBLANE = 8
_MAX_FOLD_WIDTH = 1024            # widest lane-dense fold (multiple of 128)
_MAX_LANE_TILE = 8192             # lane-axis tile for very wide, unfoldable C
_TILE_PAIR_BUDGET = 8 << 20       # (in+out) bytes per tile, single-row bias
_TILE_PAIR_BUDGET_PERIODIC = 4 << 20  # (in+out) bytes per tile, periodic bias
_PERIODIC_STEP_CAP = 8 << 20      # max (in+out) bytes for the minimum row step


def _lcm(a, b):
    return a * b // math.gcd(a, b)


def add_bias_kernel(x_ref, b_ref, o_ref):
    # b_ref is (1, W) or (tile_rows, W); the broadcast add runs on the VPU.
    o_ref[...] = (x_ref[...] + b_ref[...]).astype(o_ref.dtype)


def _row_alignment(in_itemsize, out_itemsize):
    """Sublane multiple for the row (second-minor) block dim, dtype-aware."""
    a = _SUBLANE
    for it in (in_itemsize, out_itemsize):
        if it < 4:
            a = max(a, 32 // it)   # bf16 -> 16, int8 -> 32
    return a


def _choose_fold(n_elems, c, pair_itemsize, row_align):
    """Lane-dense fold width W (multiple of 128 dividing n_elems) and the bias
    row period P (bias pattern repeats every P folded rows).
    Returns (None, None) when folding is impossible or not profitable."""
    if n_elems % _LANE != 0:
        return None, None
    base = _lcm(c, _LANE)
    if base <= 2 * _MAX_FOLD_WIDTH and n_elems % base == 0:
        # Bias fits inside one folded row (P == 1); widen up to 1024 lanes.
        w = base
        while w * 2 <= _MAX_FOLD_WIDTH and n_elems % (w * 2) == 0:
            w *= 2
        return w, 1
    # Periodic bias: W is a plain multiple of 128; pattern repeats every P rows.
    w = _LANE
    while w * 2 <= _MAX_FOLD_WIDTH and n_elems % (w * 2) == 0:
        w *= 2
    p = c // math.gcd(c, w)
    row_step = _lcm(p, row_align)
    if row_step * w * pair_itemsize > _PERIODIC_STEP_CAP:
        return None, None             # pathological C: fall back to width = C
    return w, p


def _choose_tile_rows(n_rows, bytes_per_row, row_step, budget):
    """Row tile: multiple of row_step, ~budget bytes of (in+out) per tile, or
    the full row extent if everything fits in one tile (no forced split)."""
    if n_rows <= row_step:
        return n_rows
    t = (budget // max(bytes_per_row, 1)) // row_step * row_step
    t = max(t, row_step)
    if t >= n_rows:
        return n_rows
    return t


def add_bias(x, bias):
    """x: (T, B, C), bias: (C,). Returns x + bias broadcast over (T, B)."""
    T, B, C = x.shape
    assert bias.shape == (C,)
    out_dtype = jnp.result_type(x.dtype, bias.dtype)
    in_item = jnp.dtype(x.dtype).itemsize
    out_item = jnp.dtype(out_dtype).itemsize
    pair_item = in_item + out_item
    row_align = _row_alignment(in_item, out_item)
    rows = T * B
    n_elems = rows * C

    fold_w, period = _choose_fold(n_elems, C, pair_item, row_align)

    if fold_w is not None:
        # Lane-dense layout: a contiguous reshape; every row is a full multiple
        # of 128 lanes -> unmasked stores + long contiguous DMA rows.
        width = fold_w
        n_rows = n_elems // width
        lane_tile = width
        row_step = _lcm(period, row_align)
        budget = _TILE_PAIR_BUDGET if period == 1 else _TILE_PAIR_BUDGET_PERIODIC
    else:
        # C itself is the lane dim; tile the lane axis for very wide C so the
        # double-buffered tiles always fit VMEM (matters most on v7x's 64 MiB).
        width = C
        n_rows = rows
        period = 1
        lane_tile = width if width <= _MAX_LANE_TILE else _MAX_LANE_TILE
        row_step = row_align
        budget = _TILE_PAIR_BUDGET

    x2 = x.reshape(n_rows, width)
    tile_rows = _choose_tile_rows(n_rows, lane_tile * pair_item, row_step, budget)

    # Bias slab: a single (1, width) row when the bias pattern fits in one
    # folded row, otherwise a (tile_rows, width) periodic slab (every tile
    # starts at phase 0 because tile_rows is a multiple of the period, or the
    # slab covers the whole array exactly when there is a single tile).
    slab_rows = 1 if period == 1 else tile_rows
    reps = (slab_rows * width) // C
    assert reps * C == slab_rows * width
    b2 = jnp.tile(bias, reps).reshape(slab_rows, width).astype(out_dtype)

    grid = (pl.cdiv(n_rows, tile_rows), pl.cdiv(width, lane_tile))

    x_spec = pl.BlockSpec((tile_rows, lane_tile), lambda i, j: (i, j))
    b_spec = pl.BlockSpec((slab_rows, lane_tile), lambda i, j: (0, j))
    o_spec = pl.BlockSpec((tile_rows, lane_tile), lambda i, j: (i, j))

    # Double-buffered x/out tiles + bias block + headroom for Mosaic scratch.
    x_tile_b = tile_rows * lane_tile * in_item
    o_tile_b = tile_rows * lane_tile * out_item
    b_tile_b = slab_rows * lane_tile * out_item
    needed = 2 * (x_tile_b + o_tile_b) + 2 * b_tile_b + (2 << 20)
    vmem_limit = int(max(min(needed, 48 << 20), 16 << 20))
    vmem_limit = max(vmem_limit, int(needed))    # never clamp below actual need

    # Pure HBM-streaming op: advisory cost estimate for XLA's scheduler.
    cost = pl.CostEstimate(
        flops=n_elems,
        transcendentals=0,
        bytes_accessed=n_elems * (in_item + out_item)
        + C * jnp.dtype(bias.dtype).itemsize,
    )

    # Reuse x's HBM slab for the output when dtypes match (x2 is a temporary of
    # this wrapper, so donating it is safe; each block is read before written).
    io_alias = {0: 0} if jnp.dtype(x.dtype) == jnp.dtype(out_dtype) else {}

    out = pl.pallas_call(
        add_bias_kernel,
        out_shape=jax.ShapeDtypeStruct((n_rows, width), out_dtype),
        grid_spec=pltpu.PrefetchScalarGridSpec(
            num_scalar_prefetch=0,
            grid=grid,
            in_specs=[x_spec, b_spec],
            out_specs=o_spec,
        ),
        compiler_params=pltpu.CompilerParams(
            dimension_semantics=("parallel", "parallel"),
            vmem_limit_bytes=vmem_limit,
        ),
        cost_estimate=cost,
        input_output_aliases=io_alias,
    )(x2, b2)
    return out.reshape(T, B, C)


if __name__ == "__main__":
    key = jax.random.PRNGKey(0)
    kx, kb, kx2, kb2, kx3, kb3 = jax.random.split(key, 6)

    # Primary shape implied by the module: (seq=8, batch=2, hidden=32).
    T, B, C = 8, 2, 32
    x = jax.random.normal(kx, (T, B, C), dtype=jnp.float32)
    bias = jax.random.normal(kb, (C,), dtype=jnp.float32)
    out = jax.block_until_ready(add_bias(x, bias))
    ref = x + bias.reshape(1, 1, -1)
    assert out.shape == ref.shape and out.dtype == ref.dtype
    assert jnp.allclose(out, ref, atol=1e-6, rtol=1e-6)

    # Mixed dtype (bf16 activations, f32 bias) -> promoted f32 output.
    xb = jax.random.normal(kx2, (16, 4, 96), dtype=jnp.bfloat16)
    bb = jax.random.normal(kb2, (96,), dtype=jnp.float32)
    outb = jax.block_until_ready(add_bias(xb, bb))
    refb = xb + bb.reshape(1, 1, -1)
    assert outb.shape == refb.shape and outb.dtype == refb.dtype
    assert jnp.allclose(outb, refb, atol=1e-6, rtol=1e-6)

    # Hidden size whose bias pattern does not fit one fold row (periodic slab).
    xp = jax.random.normal(kx3, (8, 2, 136), dtype=jnp.float32)
    bp = jax.random.normal(kb3, (136,), dtype=jnp.float32)
    outp = jax.block_until_ready(add_bias(xp, bp))
    refp = xp + bp.reshape(1, 1, -1)
    assert outp.shape == refp.shape and outp.dtype == refp.dtype
    assert jnp.allclose(outp, refp, atol=1e-6, rtol=1e-6)

    print("KERNEL_OK")
</pallas_src>

<mosaic_0001>
module attributes {stable_mosaic.version = 11 : i64} {
  func.func @add_bias_kernel(%arg0: i32, %arg1: i32, %arg2: memref<1x512xf32, #tpu.memory_space<vmem>>, %arg3: memref<1x512xf32, #tpu.memory_space<vmem>>, %arg4: memref<1x512xf32, #tpu.memory_space<vmem>>) attributes {dimension_semantics = [#tpu.dimension_semantics<parallel>, #tpu.dimension_semantics<parallel>], iteration_bounds = array<i64: 1, 1>, scalar_prefetch = 0 : i64, scratch_operands = 0 : i64, tpu.core_type = #tpu.core_type<tc>, window_params = [{transform_indices = @transform_0, window_bounds = array<i64: 1, 512>}, {transform_indices = @transform_1, window_bounds = array<i64: 1, 512>}, {transform_indices = @transform_2, window_bounds = array<i64: 1, 512>}]} {
    %c0 = arith.constant 0 : index
    %c0_0 = arith.constant 0 : index
    %0 = vector.load %arg2[%c0, %c0_0] : memref<1x512xf32, #tpu.memory_space<vmem>>, vector<1x512xf32>
    %c0_1 = arith.constant 0 : index
    %c0_2 = arith.constant 0 : index
    %1 = vector.load %arg3[%c0_1, %c0_2] : memref<1x512xf32, #tpu.memory_space<vmem>>, vector<1x512xf32>
    %2 = arith.addf %0, %1 : vector<1x512xf32>
    %c0_3 = arith.constant 0 : index
    %c0_4 = arith.constant 0 : index
    %3 = vector.load %arg4[%c0_3, %c0_4] : memref<1x512xf32, #tpu.memory_space<vmem>>, vector<1x512xf32>
    tpu.vector_store %arg4[%c0_3, %c0_4], %2 {strides = array<i32>} : memref<1x512xf32, #tpu.memory_space<vmem>>, vector<1x512xf32>,
    return
  }
  func.func @transform_0(%arg0: i32, %arg1: i32) -> (i32, i32) {
    %c0_i32 = arith.constant 0 : i32
    return %arg0, %arg1 : i32, i32
  }
  func.func @transform_1(%arg0: i32, %arg1: i32) -> (i32, i32) {
    %c0_i32 = arith.constant 0 : i32
    %c0_i32_0 = arith.constant 0 : i32
    return %c0_i32, %arg1 : i32, i32
  }
  func.func @transform_2(%arg0: i32, %arg1: i32) -> (i32, i32) {
    %c0_i32 = arith.constant 0 : i32
    return %arg0, %arg1 : i32, i32
  }
}

</mosaic_0001>

<bundles_post_ra>
// kernel: tpu_custom_call.1
= control target key start
LH: loop header
LB: loop body
LE: loop exit
PB: predicated region body
PF: predicated region fallthrough
CT: control target
= control target key end

     0   :  { %7 = vsyncpa [#allocation3], 0  ;;  %s141_s0 = inlined_call_operand.hbm [shape: f32[1,512], index: 0, kind: input, shape index: {}, may-alias: {0,2}]   ;;  %s142_s1 = inlined_call_operand.vmem [shape: f32[1,512], index: 1, kind: input, shape index: {}]   ;;  %s143_s2 = inlined_call_operand.hbm [shape: f32[1,512], index: 2, kind: output, shape index: {}, may-alias: {0,2}]  }
   0x1   :  { %8 = vsyncpa [#allocation4], 0  ;;  %s97_s9 = smov [#allocation2]   ;;  %s49_s13 = scalar_lea.hbm %s141_s0, 64 }
   0x2   :  { %s15_s10 = sshll.u32 %s97_s9, 4  ;;  %p50_p0 = scmp.ne.s32.totalorder %s141_s0, %s49_s13  ;;  %s16_s10 = int_to_ptr.vmem [resolvable:$true] %s15_s10 }
   0x3   :  { %p53_p1 = scmp.lt.u32.totalorder %s49_s13, %s141_s0 }
   0x5   :  { %p55_p2 = pnand %p53_p1, %p50_p0 }
   0x7   :  { %58 = shalt.err (!%p55_p2)
}
   0x8   :  { %s59_s18 = scalar_lea.vmem %s16_s10, 64  ;;  %p64_p4 = scmp.lt.s32.totalorder %s16_s10, %s16_s10 }
   0x9   :  { %p60_p3 = scmp.ne.s32.totalorder %s16_s10, %s59_s18  ;;  %p65_p5 = scmp.lt.s32.totalorder %s59_s18, %s59_s18 }
   0xb   :  { %p66_p6 = por %p65_p5, %p64_p4 }
   0xd   :  { %p67_p7 = pnand %p66_p6, %p60_p3 }
   0xf   :  { %70 = shalt.err (!%p67_p7)
}
  0x10   :  { %18 = dma.hbm_to_vmem [thread:$0]  %s141_s0, 64, %s16_s10, [#allocation3]  }
  0x11   :  { %93 = dma.done.wait [#allocation3], 64  }
  0x12   :  { %94 = vsyncadd [#allocation3], 4294967232  ;;  %v27_v0 = vlaneseq  ;;  %s98_s21 = smov [#allocation5]   ;;  %v24_v1 = vld [vmem:[#allocation2] sm:$0xf] }
  0x13   :  { %s38_s22 = sshll.u32 %s98_s21, 4  ;;  %v25_v2 = vld [vmem:[%s142_s1] sm:$0xf]  ;;  %s39_s22 = int_to_ptr.vmem [resolvable:$true] %s38_s22 }
  0x14   :  { %vm29_vm0 = vcmp.lt.s32.totalorder %v27_v0, 512  ;;  %v26_v3 = vadd.f32 %v25_v2, %v24_v1  ;;  %s71_s25 = scalar_lea.vmem %s39_s22, 64  ;;  %p76_p9 = scmp.lt.s32.totalorder %s39_s22, %s39_s22 }
  0x15   :  { %p72_p8 = scmp.ne.s32.totalorder %s39_s22, %s71_s25  ;;  %p77_p10 = scmp.lt.s32.totalorder %s71_s25, %s71_s25 }
  0x16   :  { %31 = vst.msk [vmem:[#allocation5] sm:$0xf] %vm29_vm0, %v26_v3 }
  0x17   :  { %p78_p11 = por %p77_p10, %p76_p9 }
  0x19   :  { %p79_p12 = pnand %p78_p11, %p72_p8 }
  0x1b   :  { %82 = shalt.err (!%p79_p12)
}
  0x1c   :  { %s83_s27 = scalar_lea.hbm %s143_s2, 64 }
  0x1d   :  { %p84_p13 = scmp.ne.s32.totalorder %s143_s2, %s83_s27  ;;  %p87_p0 = scmp.lt.u32.totalorder %s83_s27, %s143_s2 }
  0x1f   :  { %p89_p1 = pnand %p87_p0, %p84_p13 }
  0x21   :  { %92 = shalt.err (!%p89_p1)
}
  0x22   :  { %41 = dma.vmem_to_hbm [thread:$0]  %s39_s22, 64, %s143_s2, [#allocation4]  }
  0x23   :  { %95 = dma.done.wait [#allocation4], 64  }
  0x24   :  { %96 = vsyncadd [#allocation4], 4294967232 }
  0x25   :  { %45 = vsyncpa [#allocation3], 1 }
  0x26   :  { %46 = vsyncpa [#allocation4], 1 }

</bundles_post_ra>
